<compile_context>
chip_gen: v7x
topology: tpu7x:2x2x1
jax: 0.10.0
libtpu: 0.0.40
codegen_flags: <defaults>
</compile_context>

<pallas_src>
import functools
import math

import jax
import jax.numpy as jnp
from jax.experimental import pallas as pl
from jax.experimental.pallas import tpu as pltpu

EPS = 1e-5
LANE = 128


def _round_up(x, m):
    return ((x + m - 1) // m) * m


def _row_align(dtype):
    # Sublane packing of the activation dtype: f32 -> 8, bf16 -> 16, int8/fp8 -> 32.
    return max(8, 32 // jnp.dtype(dtype).itemsize)


def _vmem_capacity_bytes():
    try:
        return int(pltpu.get_tpu_info().vmem_capacity_bytes)
    except Exception:
        return 64 * 1024 * 1024  # conservative: v7x per-TensorCore VMEM


def prepare_mlp_block_params(norm_weight, w1_t, w3_t, w2_t,
                             matmul_dtype=jnp.bfloat16, hidden_tile=None):
    """Fuse / pad / cast the MLP weights ONCE (do not call per step).

    w1_t, w3_t: (dim, hidden) pre-transposed nn.Linear weights; w2_t: (hidden, dim).
    Returns a dict consumed by mlp_block().
    """
    dim, hidden = w1_t.shape
    mm_dtype = jnp.dtype(matmul_dtype)
    w_itemsize = mm_dtype.itemsize

    if hidden_tile is None:
        # Per-TensorCore budget (each TC holds its own copy under "parallel").
        budget = max(_vmem_capacity_bytes() - 8 * 1024 * 1024, 8 * 1024 * 1024)
        hp_full = _round_up(hidden, LANE)
        resident_bytes = 3 * dim * hp_full * w_itemsize  # w13 (dim,2hp) + w2 (hp,dim)
        if resident_bytes <= budget // 3:
            hidden_tile = hp_full                      # fully resident weights (nh == 1)
        else:
            # Stream hidden tiles; give ~1/3 of VMEM to double-buffered weight tiles.
            per_col = 3 * dim * w_itemsize
            hidden_tile = ((budget // 3) // (2 * per_col)) // LANE * LANE
            hidden_tile = int(max(LANE, min(hidden_tile, hp_full)))
    hidden_tile = _round_up(int(hidden_tile), LANE)
    hp = _round_up(hidden, hidden_tile)
    nh = hp // hidden_tile

    f32 = jnp.float32
    w1p = jnp.zeros((dim, hp), f32).at[:, :hidden].set(w1_t.astype(f32))
    w3p = jnp.zeros((dim, hp), f32).at[:, :hidden].set(w3_t.astype(f32))
    w2p = jnp.zeros((hp, dim), f32).at[:hidden, :].set(w2_t.astype(f32))
    # Interleave per hidden tile so the (dim, 2*th) column block j is exactly
    # [w1_tile_j | w3_tile_j] -- the gate/up halves always travel together.
    w13 = jnp.stack(
        [w1p.reshape(dim, nh, hidden_tile), w3p.reshape(dim, nh, hidden_tile)],
        axis=2,
    ).reshape(dim, 2 * hp)

    return dict(
        gamma=jnp.asarray(norm_weight, f32).reshape(1, dim),
        w13=w13.astype(mm_dtype),
        w2=w2p.astype(mm_dtype),
        dim=int(dim),
        hidden=int(hidden),
        hidden_padded=int(hp),
        hidden_tile=int(hidden_tile),
        matmul_dtype=mm_dtype,
    )


def _mlp_block_kernel(x_ref, g_ref, w13_ref, w2_ref, o_ref, xn_ref, acc_ref, *, th):
    # x_ref: (tm, dim)          resident across the hidden axis
    # g_ref: (1, dim)           RMSNorm gamma
    # w13_ref: (dim, 2*th)      hidden tile k: [w1_tile | w3_tile]
    # w2_ref: (th, dim)         matching rows of w2
    # xn_ref: (tm, dim) scratch (matmul dtype), acc_ref: (tm, dim) f32 scratch
    k = pl.program_id(1)

    @pl.when(k == 0)
    def _():
        xf = x_ref[...].astype(jnp.float32)
        ms = jnp.mean(xf * xf, axis=-1, keepdims=True)
        xn = (xf * jax.lax.rsqrt(ms + EPS)).astype(x_ref.dtype) * g_ref[...]
        xn_ref[...] = xn.astype(xn_ref.dtype)
        acc_ref[...] = jnp.zeros_like(acc_ref)

    # Fused gate/up GEMM for this hidden tile: (tm, dim) @ (dim, 2*th), f32 acc.
    h13 = jnp.dot(xn_ref[...], w13_ref[...], preferred_element_type=jnp.float32)
    h1 = h13[:, :th]
    h3 = h13[:, th:]
    gated = (h1 * jax.nn.sigmoid(h1)) * h3          # SiLU(w1 x) * (w3 x), in f32
    acc_ref[...] += jnp.dot(gated.astype(w2_ref.dtype), w2_ref[...],
                            preferred_element_type=jnp.float32)

    @pl.when(k == pl.num_programs(1) - 1)
    def _():
        o_ref[...] = (x_ref[...].astype(jnp.float32) + acc_ref[...]).astype(o_ref.dtype)


def mlp_block(x, params, *, tm=1024):
    """x: (..., dim). Computes x + w2(silu(w1(rmsnorm(x))) * w3(rmsnorm(x)))."""
    dim = params["dim"]
    hp = params["hidden_padded"]
    th = params["hidden_tile"]
    nh = hp // th
    mm_dtype = params["matmul_dtype"]

    assert x.shape[-1] == dim
    orig_shape = x.shape
    M = math.prod(orig_shape[:-1])
    x2 = x.reshape(M, dim)

    x_itemsize = jnp.dtype(x.dtype).itemsize
    w_itemsize = jnp.dtype(mm_dtype).itemsize
    row_align = _row_align(x.dtype)

    # Per-TensorCore VMEM budget (v7x: 64 MiB/TC, v5e/v6e: 128 MiB) minus headroom.
    budget = max(_vmem_capacity_bytes() - 8 * 1024 * 1024, 8 * 1024 * 1024)

    tm = _round_up(max(row_align, min(int(tm), M)), row_align)

    def vmem_need(tm_):
        act = 2 * 2 * tm_ * dim * x_itemsize          # x / out tiles, double-buffered
        wts = 2 * (3 * dim * th) * w_itemsize         # weight tiles (worst case 2 buffers)
        scr = tm_ * dim * (w_itemsize + 4)            # xn + f32 accumulator scratch
        tmp = tm_ * (3 * th + dim) * 4                # h13 / gated / f32 temporaries
        return act + wts + scr + tmp + (2 << 20)      # compiler-internal slack

    while tm > row_align and vmem_need(tm) > budget:
        tm = _round_up(max(row_align, tm // 2), row_align)

    nm = (M + tm - 1) // tm         # partial tail block handled by Pallas masking
    grid = (nm, nh)

    w_reads = (nm if nh > 1 else 1) * 3 * dim * hp * w_itemsize
    cost = pl.CostEstimate(
        flops=6 * M * dim * hp,
        transcendentals=M * (hp + 1),
        bytes_accessed=2 * M * dim * x_itemsize + w_reads + dim * 4,
    )
    vmem_limit = int(min(budget, max(2 * vmem_need(tm), 32 * 1024 * 1024)))

    def spec(shape, imap, mode=None):
        if mode is None:
            return pl.BlockSpec(shape, imap)
        return pl.BlockSpec(shape, imap, pipeline_mode=mode)

    def run(resident_mode):
        w_mode = resident_mode if nh == 1 else None
        grid_spec = pltpu.PrefetchScalarGridSpec(
            num_scalar_prefetch=0,
            grid=grid,
            in_specs=[
                spec((tm, dim), lambda i, k: (i, 0)),                  # activation rows
                spec((1, dim), lambda i, k: (0, 0), resident_mode),    # rmsnorm gamma
                spec((dim, 2 * th), lambda i, k: (0, k), w_mode),      # [w1 | w3] tile
                spec((th, dim), lambda i, k: (k, 0), w_mode),          # w2 tile
            ],
            out_specs=spec((tm, dim), lambda i, k: (i, 0)),
            scratch_shapes=[
                pltpu.VMEM((tm, dim), mm_dtype),     # normalized activations
                pltpu.VMEM((tm, dim), jnp.float32),  # f32 output accumulator
            ],
        )
        return pl.pallas_call(
            functools.partial(_mlp_block_kernel, th=th),
            out_shape=jax.ShapeDtypeStruct((M, dim), x.dtype),
            grid_spec=grid_spec,
            compiler_params=pltpu.CompilerParams(
                dimension_semantics=("parallel", "arbitrary"),
                vmem_limit_bytes=vmem_limit,
            ),
            cost_estimate=cost,
        )(x2, params["gamma"], params["w13"], params["w2"])

    if nh == 1:
        try:
            # Grid-invariant gamma/weights: a single VMEM buffer is enough.
            out = run(pl.Buffered(1))
        except Exception:
            # Fallback for lowerings without 1-deep pipeline_mode support.
            out = run(None)
    else:
        out = run(None)

    return out.reshape(orig_shape)


def reference(x, norm_weight, w1_t, w3_t, w2_t):
    xf = x.astype(jnp.float32)
    ms = jnp.mean(xf * xf, axis=-1, keepdims=True)
    xn = (xf * jax.lax.rsqrt(ms + EPS)).astype(x.dtype) * norm_weight
    h1 = jnp.dot(xn, w1_t, preferred_element_type=jnp.float32)
    h3 = jnp.dot(xn, w3_t, preferred_element_type=jnp.float32)
    y = jnp.dot((h1 * jax.nn.sigmoid(h1)) * h3, w2_t,
                preferred_element_type=jnp.float32)
    return (xf + y).astype(x.dtype)


if __name__ == "__main__":
    # MLPBlock(dim=128, hidden_dim=192): FFN hidden = int(2 * 192 / 3) = 128.
    B, S, dim, hidden_dim = 2, 8, 128, 192
    hidden = int(2 * hidden_dim / 3)

    key = jax.random.PRNGKey(0)
    kx, k1, k2, k3, kb1, kb2, k1b, k2b, k3b = jax.random.split(key, 9)

    x = jax.random.normal(kx, (B, S, dim), dtype=jnp.float32)

    s_in = 1.0 / math.sqrt(dim)
    s_hid = 1.0 / math.sqrt(hidden)
    w1_t = jax.random.uniform(k1, (dim, hidden), minval=-s_in, maxval=s_in, dtype=jnp.float32)
    w3_t = jax.random.uniform(k3, (dim, hidden), minval=-s_in, maxval=s_in, dtype=jnp.float32)
    w2_t = jax.random.uniform(k2, (hidden, dim), minval=-s_hid, maxval=s_hid, dtype=jnp.float32)
    norm_weight = jnp.ones((dim,), dtype=jnp.float32)  # RMSNorm init

    ref = reference(x, norm_weight, w1_t, w3_t, w2_t)

    # 1) Explicit f32 MXU path: strict check against the reference.
    p_f32 = prepare_mlp_block_params(norm_weight, w1_t, w3_t, w2_t,
                                     matmul_dtype=jnp.float32)
    out = jax.block_until_ready(mlp_block(x, p_f32))
    assert out.shape == (B, S, dim)
    assert jnp.allclose(out, ref, atol=1e-4, rtol=1e-4)

    # 2) Default fast path: bf16 MXU inputs with f32 accumulation (loose tolerance).
    p_bf16 = prepare_mlp_block_params(norm_weight, w1_t, w3_t, w2_t)
    out_bf16 = jax.block_until_ready(mlp_block(x, p_bf16))
    assert jnp.allclose(out_bf16, ref, atol=5e-2, rtol=5e-2)

    # 3) Multi-step row grid with a partial tail block (M=600, tm=256 -> grid (3, 1)).
    x_big = jax.random.normal(kb1, (2, 300, dim), dtype=jnp.float32)
    out_big = jax.block_until_ready(mlp_block(x_big, p_f32, tm=256))
    ref_big = reference(x_big, norm_weight, w1_t, w3_t, w2_t)
    assert out_big.shape == x_big.shape
    assert jnp.allclose(out_big, ref_big, atol=1e-4, rtol=1e-4)

    # 4) Streamed-weight path: hidden=256 split into two 128-wide tiles (grid (4, 2)).
    hidden2 = int(2 * 384 / 3)  # 256
    s2_hid = 1.0 / math.sqrt(hidden2)
    w1b = jax.random.uniform(k1b, (dim, hidden2), minval=-s_in, maxval=s_in, dtype=jnp.float32)
    w3b = jax.random.uniform(k3b, (dim, hidden2), minval=-s_in, maxval=s_in, dtype=jnp.float32)
    w2b = jax.random.uniform(k2b, (hidden2, dim), minval=-s2_hid, maxval=s2_hid, dtype=jnp.float32)
    p_stream = prepare_mlp_block_params(norm_weight, w1b, w3b, w2b,
                                        matmul_dtype=jnp.float32, hidden_tile=128)
    x_s = jax.random.normal(kb2, (2, 512, dim), dtype=jnp.float32)
    out_s = jax.block_until_ready(mlp_block(x_s, p_stream, tm=256))
    ref_s = reference(x_s, norm_weight, w1b, w3b, w2b)
    assert out_s.shape == x_s.shape
    assert jnp.allclose(out_s, ref_s, atol=1e-4, rtol=1e-4)

    print("KERNEL_OK")
</pallas_src>

<mosaic_0001>
module attributes {stable_mosaic.version = 11 : i64} {
  func.func @_mlp_block_kernel(%arg0: i32, %arg1: i32, %arg2: memref<16x128xf32, #tpu.memory_space<vmem>>, %arg3: memref<1x128xf32, #tpu.memory_space<vmem>>, %arg4: memref<128x256xf32, #tpu.memory_space<vmem>>, %arg5: memref<128x128xf32, #tpu.memory_space<vmem>>, %arg6: memref<16x128xf32, #tpu.memory_space<vmem>>, %arg7: memref<16x128xf32, #tpu.memory_space<vmem>>, %arg8: memref<16x128xf32, #tpu.memory_space<vmem>>) attributes {dimension_semantics = [#tpu.dimension_semantics<parallel>, #tpu.dimension_semantics<arbitrary>], iteration_bounds = array<i64: 1, 1>, scalar_prefetch = 0 : i64, scratch_operands = 2 : i64, tpu.core_type = #tpu.core_type<tc>, window_params = [{transform_indices = @transform_0, window_bounds = array<i64: 16, 128>}, {pipeline_mode = #tpu.pipeline_mode<synchronous>, transform_indices = @transform_1, window_bounds = array<i64: 1, 128>}, {pipeline_mode = #tpu.pipeline_mode<synchronous>, transform_indices = @transform_2, window_bounds = array<i64: 128, 256>}, {pipeline_mode = #tpu.pipeline_mode<synchronous>, transform_indices = @transform_3, window_bounds = array<i64: 128, 128>}, {transform_indices = @transform_4, window_bounds = array<i64: 16, 128>}]} {
    %c0_i32 = arith.constant 0 : i32
    %0 = arith.cmpi eq, %arg1, %c0_i32 : i32
    %1 = arith.extui %0 : i1 to i32
    %c0_i32_0 = arith.constant 0 : i32
    %2 = arith.cmpi ne, %1, %c0_i32_0 : i32
    scf.if %2 {
      %c0_14 = arith.constant 0 : index
      %c0_15 = arith.constant 0 : index
      %23 = vector.load %arg2[%c0_14, %c0_15] : memref<16x128xf32, #tpu.memory_space<vmem>>, vector<16x128xf32>
      %24 = arith.mulf %23, %23 : vector<16x128xf32>
      %cst_16 = arith.constant dense<0.000000e+00> : vector<16xf32>
      %25 = vector.multi_reduction <add>, %24, %cst_16 [1] : vector<16x128xf32> to vector<16xf32>
      %26 = vector.shape_cast %25 : vector<16xf32> to vector<16x1xf32>
      %cst_17 = arith.constant 1.280000e+02 : f32
      %27 = vector.broadcast %cst_17 : f32 to vector<16x1xf32>
      %28 = arith.divf %26, %27 : vector<16x1xf32>
      %cst_18 = arith.constant 9.99999974E-6 : f32
      %29 = vector.broadcast %cst_18 : f32 to vector<16x1xf32>
      %30 = arith.addf %28, %29 : vector<16x1xf32>
      %31 = math.rsqrt %30 : vector<16x1xf32>
      %32 = vector.broadcast %31 : vector<16x1xf32> to vector<16x128xf32>
      %33 = arith.mulf %23, %32 : vector<16x128xf32>
      %c0_19 = arith.constant 0 : index
      %c0_20 = arith.constant 0 : index
      %34 = vector.load %arg3[%c0_19, %c0_20] : memref<1x128xf32, #tpu.memory_space<vmem>>, vector<1x128xf32>
      %35 = vector.broadcast %34 : vector<1x128xf32> to vector<16x128xf32>
      %36 = arith.mulf %33, %35 : vector<16x128xf32>
      %c0_21 = arith.constant 0 : index
      %c0_22 = arith.constant 0 : index
      %37 = vector.load %arg7[%c0_21, %c0_22] : memref<16x128xf32, #tpu.memory_space<vmem>>, vector<16x128xf32>
      tpu.vector_store %arg7[%c0_21, %c0_22], %36 {strides = array<i32>} : memref<16x128xf32, #tpu.memory_space<vmem>>, vector<16x128xf32>,
      %cst_23 = arith.constant 0.000000e+00 : f32
      %38 = vector.broadcast %cst_23 : f32 to vector<16x128xf32>
      %c0_24 = arith.constant 0 : index
      %c0_25 = arith.constant 0 : index
      %39 = vector.load %arg8[%c0_24, %c0_25] : memref<16x128xf32, #tpu.memory_space<vmem>>, vector<16x128xf32>
      tpu.vector_store %arg8[%c0_24, %c0_25], %38 {strides = array<i32>} : memref<16x128xf32, #tpu.memory_space<vmem>>, vector<16x128xf32>,
    } else {
    }
    %c0 = arith.constant 0 : index
    %c0_1 = arith.constant 0 : index
    %3 = vector.load %arg7[%c0, %c0_1] : memref<16x128xf32, #tpu.memory_space<vmem>>, vector<16x128xf32>
    %c0_2 = arith.constant 0 : index
    %c0_3 = arith.constant 0 : index
    %4 = vector.load %arg4[%c0_2, %c0_3] : memref<128x256xf32, #tpu.memory_space<vmem>>, vector<128x256xf32>
    %cst = arith.constant dense<0.000000e+00> : vector<16x256xf32>
    %5 = tpu.matmul %3, %4, %cst {dimension_numbers = #tpu.dot_dimension_numbers<[1], [0], [0], [1], [0, 0, 1, 1], [], []>} : vector<16x128xf32>, vector<128x256xf32>, vector<16x256xf32> -> vector<16x256xf32>
    %6 = vector.extract_strided_slice %5 {offsets = [0, 0], sizes = [16, 128], strides = [1, 1]} : vector<16x256xf32> to vector<16x128xf32>
    %7 = vector.extract_strided_slice %5 {offsets = [0, 128], sizes = [16, 128], strides = [1, 1]} : vector<16x256xf32> to vector<16x128xf32>
    %8 = arith.negf %6 : vector<16x128xf32>
    %9 = math.exp %8 : vector<16x128xf32>
    %cst_4 = arith.constant 1.000000e+00 : f32
    %10 = vector.broadcast %cst_4 : f32 to vector<16x128xf32>
    %11 = arith.addf %10, %9 : vector<16x128xf32>
    %12 = arith.divf %10, %11 : vector<16x128xf32>
    %13 = arith.mulf %6, %12 : vector<16x128xf32>
    %14 = arith.mulf %13, %7 : vector<16x128xf32>
    %c0_5 = arith.constant 0 : index
    %c0_6 = arith.constant 0 : index
    %15 = vector.load %arg8[%c0_5, %c0_6] : memref<16x128xf32, #tpu.memory_space<vmem>>, vector<16x128xf32>
    %c0_7 = arith.constant 0 : index
    %c0_8 = arith.constant 0 : index
    %16 = vector.load %arg5[%c0_7, %c0_8] : memref<128x128xf32, #tpu.memory_space<vmem>>, vector<128x128xf32>
    %cst_9 = arith.constant dense<0.000000e+00> : vector<16x128xf32>
    %17 = tpu.matmul %14, %16, %cst_9 {dimension_numbers = #tpu.dot_dimension_numbers<[1], [0], [0], [1], [0, 0, 1, 1], [], []>} : vector<16x128xf32>, vector<128x128xf32>, vector<16x128xf32> -> vector<16x128xf32>
    %18 = arith.addf %15, %17 : vector<16x128xf32>
    %c0_10 = arith.constant 0 : index
    %c0_11 = arith.constant 0 : index
    %19 = vector.load %arg8[%c0_10, %c0_11] : memref<16x128xf32, #tpu.memory_space<vmem>>, vector<16x128xf32>
    tpu.vector_store %arg8[%c0_10, %c0_11], %18 {strides = array<i32>} : memref<16x128xf32, #tpu.memory_space<vmem>>, vector<16x128xf32>,
    %c0_i32_12 = arith.constant 0 : i32
    %20 = arith.cmpi eq, %arg1, %c0_i32_12 : i32
    %21 = arith.extui %20 : i1 to i32
    %c0_i32_13 = arith.constant 0 : i32
    %22 = arith.cmpi ne, %21, %c0_i32_13 : i32
    scf.if %22 {
      %c0_14 = arith.constant 0 : index
      %c0_15 = arith.constant 0 : index
      %23 = vector.load %arg2[%c0_14, %c0_15] : memref<16x128xf32, #tpu.memory_space<vmem>>, vector<16x128xf32>
      %c0_16 = arith.constant 0 : index
      %c0_17 = arith.constant 0 : index
      %24 = vector.load %arg8[%c0_16, %c0_17] : memref<16x128xf32, #tpu.memory_space<vmem>>, vector<16x128xf32>
      %25 = arith.addf %23, %24 : vector<16x128xf32>
      %c0_18 = arith.constant 0 : index
      %c0_19 = arith.constant 0 : index
      %26 = vector.load %arg6[%c0_18, %c0_19] : memref<16x128xf32, #tpu.memory_space<vmem>>, vector<16x128xf32>
      tpu.vector_store %arg6[%c0_18, %c0_19], %25 {strides = array<i32>} : memref<16x128xf32, #tpu.memory_space<vmem>>, vector<16x128xf32>,
    } else {
    }
    return
  }
  func.func @transform_0(%arg0: i32, %arg1: i32) -> (i32, i32) {
    %c0_i32 = arith.constant 0 : i32
    %c0_i32_0 = arith.constant 0 : i32
    return %arg0, %c0_i32 : i32, i32
  }
  func.func @transform_1(%arg0: i32, %arg1: i32) -> (i32, i32) {
    %c0_i32 = arith.constant 0 : i32
    %c0_i32_0 = arith.constant 0 : i32
    %c0_i32_1 = arith.constant 0 : i32
    return %c0_i32, %c0_i32_0 : i32, i32
  }
  func.func @transform_2(%arg0: i32, %arg1: i32) -> (i32, i32) {
    %c0_i32 = arith.constant 0 : i32
    %c0_i32_0 = arith.constant 0 : i32
    return %c0_i32, %arg1 : i32, i32
  }
  func.func @transform_3(%arg0: i32, %arg1: i32) -> (i32, i32) {
    %c0_i32 = arith.constant 0 : i32
    %c0_i32_0 = arith.constant 0 : i32
    return %arg1, %c0_i32 : i32, i32
  }
  func.func @transform_4(%arg0: i32, %arg1: i32) -> (i32, i32) {
    %c0_i32 = arith.constant 0 : i32
    %c0_i32_0 = arith.constant 0 : i32
    return %arg0, %c0_i32 : i32, i32
  }
}

module attributes {stable_mosaic.version = 11 : i64} {
  func.func @_mlp_block_kernel(%arg0: i32, %arg1: i32, %arg2: memref<16x128xf32, #tpu.memory_space<vmem>>, %arg3: memref<1x128xf32, #tpu.memory_space<vmem>>, %arg4: memref<128x256xf32, #tpu.memory_space<vmem>>, %arg5: memref<128x128xf32, #tpu.memory_space<vmem>>, %arg6: memref<16x128xf32, #tpu.memory_space<vmem>>, %arg7: memref<16x128xf32, #tpu.memory_space<vmem>>, %arg8: memref<16x128xf32, #tpu.memory_space<vmem>>) attributes {dimension_semantics = [#tpu.dimension_semantics<parallel>, #tpu.dimension_semantics<arbitrary>], iteration_bounds = array<i64: 1, 1>, scalar_prefetch = 0 : i64, scratch_operands = 2 : i64, tpu.core_type = #tpu.core_type<tc>, window_params = [{transform_indices = @transform_0, window_bounds = array<i64: 16, 128>}, {pipeline_mode = #tpu.pipeline_mode<synchronous>, transform_indices = @transform_1, window_bounds = array<i64: 1, 128>}, {transform_indices = @transform_2, window_bounds = array<i64: 128, 256>}, {transform_indices = @transform_3, window_bounds = array<i64: 128, 128>}, {transform_indices = @transform_4, window_bounds = array<i64: 16, 128>}]} {
    %c0_i32 = arith.constant 0 : i32
    %0 = arith.cmpi eq, %arg1, %c0_i32 : i32
    %1 = arith.extui %0 : i1 to i32
    %c0_i32_0 = arith.constant 0 : i32
    %2 = arith.cmpi ne, %1, %c0_i32_0 : i32
    scf.if %2 {
      %c0_14 = arith.constant 0 : index
      %c0_15 = arith.constant 0 : index
      %23 = vector.load %arg2[%c0_14, %c0_15] : memref<16x128xf32, #tpu.memory_space<vmem>>, vector<16x128xf32>
      %24 = arith.mulf %23, %23 : vector<16x128xf32>
      %cst_16 = arith.constant dense<0.000000e+00> : vector<16xf32>
      %25 = vector.multi_reduction <add>, %24, %cst_16 [1] : vector<16x128xf32> to vector<16xf32>
      %26 = vector.shape_cast %25 : vector<16xf32> to vector<16x1xf32>
      %cst_17 = arith.constant 1.280000e+02 : f32
      %27 = vector.broadcast %cst_17 : f32 to vector<16x1xf32>
      %28 = arith.divf %26, %27 : vector<16x1xf32>
      %cst_18 = arith.constant 9.99999974E-6 : f32
      %29 = vector.broadcast %cst_18 : f32 to vector<16x1xf32>
      %30 = arith.addf %28, %29 : vector<16x1xf32>
      %31 = math.rsqrt %30 : vector<16x1xf32>
      %32 = vector.broadcast %31 : vector<16x1xf32> to vector<16x128xf32>
      %33 = arith.mulf %23, %32 : vector<16x128xf32>
      %c0_19 = arith.constant 0 : index
      %c0_20 = arith.constant 0 : index
      %34 = vector.load %arg3[%c0_19, %c0_20] : memref<1x128xf32, #tpu.memory_space<vmem>>, vector<1x128xf32>
      %35 = vector.broadcast %34 : vector<1x128xf32> to vector<16x128xf32>
      %36 = arith.mulf %33, %35 : vector<16x128xf32>
      %c0_21 = arith.constant 0 : index
      %c0_22 = arith.constant 0 : index
      %37 = vector.load %arg7[%c0_21, %c0_22] : memref<16x128xf32, #tpu.memory_space<vmem>>, vector<16x128xf32>
      tpu.vector_store %arg7[%c0_21, %c0_22], %36 {strides = array<i32>} : memref<16x128xf32, #tpu.memory_space<vmem>>, vector<16x128xf32>,
      %cst_23 = arith.constant 0.000000e+00 : f32
      %38 = vector.broadcast %cst_23 : f32 to vector<16x128xf32>
      %c0_24 = arith.constant 0 : index
      %c0_25 = arith.constant 0 : index
      %39 = vector.load %arg8[%c0_24, %c0_25] : memref<16x128xf32, #tpu.memory_space<vmem>>, vector<16x128xf32>
      tpu.vector_store %arg8[%c0_24, %c0_25], %38 {strides = array<i32>} : memref<16x128xf32, #tpu.memory_space<vmem>>, vector<16x128xf32>,
    } else {
    }
    %c0 = arith.constant 0 : index
    %c0_1 = arith.constant 0 : index
    %3 = vector.load %arg7[%c0, %c0_1] : memref<16x128xf32, #tpu.memory_space<vmem>>, vector<16x128xf32>
    %c0_2 = arith.constant 0 : index
    %c0_3 = arith.constant 0 : index
    %4 = vector.load %arg4[%c0_2, %c0_3] : memref<128x256xf32, #tpu.memory_space<vmem>>, vector<128x256xf32>
    %cst = arith.constant dense<0.000000e+00> : vector<16x256xf32>
    %5 = tpu.matmul %3, %4, %cst {dimension_numbers = #tpu.dot_dimension_numbers<[1], [0], [0], [1], [0, 0, 1, 1], [], []>} : vector<16x128xf32>, vector<128x256xf32>, vector<16x256xf32> -> vector<16x256xf32>
    %6 = vector.extract_strided_slice %5 {offsets = [0, 0], sizes = [16, 128], strides = [1, 1]} : vector<16x256xf32> to vector<16x128xf32>
    %7 = vector.extract_strided_slice %5 {offsets = [0, 128], sizes = [16, 128], strides = [1, 1]} : vector<16x256xf32> to vector<16x128xf32>
    %8 = arith.negf %6 : vector<16x128xf32>
    %9 = math.exp %8 : vector<16x128xf32>
    %cst_4 = arith.constant 1.000000e+00 : f32
    %10 = vector.broadcast %cst_4 : f32 to vector<16x128xf32>
    %11 = arith.addf %10, %9 : vector<16x128xf32>
    %12 = arith.divf %10, %11 : vector<16x128xf32>
    %13 = arith.mulf %6, %12 : vector<16x128xf32>
    %14 = arith.mulf %13, %7 : vector<16x128xf32>
    %c0_5 = arith.constant 0 : index
    %c0_6 = arith.constant 0 : index
    %15 = vector.load %arg8[%c0_5, %c0_6] : memref<16x128xf32, #tpu.memory_space<vmem>>, vector<16x128xf32>
    %c0_7 = arith.constant 0 : index
    %c0_8 = arith.constant 0 : index
    %16 = vector.load %arg5[%c0_7, %c0_8] : memref<128x128xf32, #tpu.memory_space<vmem>>, vector<128x128xf32>
    %cst_9 = arith.constant dense<0.000000e+00> : vector<16x128xf32>
    %17 = tpu.matmul %14, %16, %cst_9 {dimension_numbers = #tpu.dot_dimension_numbers<[1], [0], [0], [1], [0, 0, 1, 1], [], []>} : vector<16x128xf32>, vector<128x128xf32>, vector<16x128xf32> -> vector<16x128xf32>
    %18 = arith.addf %15, %17 : vector<16x128xf32>
    %c0_10 = arith.constant 0 : index
    %c0_11 = arith.constant 0 : index
    %19 = vector.load %arg8[%c0_10, %c0_11] : memref<16x128xf32, #tpu.memory_space<vmem>>, vector<16x128xf32>
    tpu.vector_store %arg8[%c0_10, %c0_11], %18 {strides = array<i32>} : memref<16x128xf32, #tpu.memory_space<vmem>>, vector<16x128xf32>,
    %c0_i32_12 = arith.constant 0 : i32
    %20 = arith.cmpi eq, %arg1, %c0_i32_12 : i32
    %21 = arith.extui %20 : i1 to i32
    %c0_i32_13 = arith.constant 0 : i32
    %22 = arith.cmpi ne, %21, %c0_i32_13 : i32
    scf.if %22 {
      %c0_14 = arith.constant 0 : index
      %c0_15 = arith.constant 0 : index
      %23 = vector.load %arg2[%c0_14, %c0_15] : memref<16x128xf32, #tpu.memory_space<vmem>>, vector<16x128xf32>
      %c0_16 = arith.constant 0 : index
      %c0_17 = arith.constant 0 : index
      %24 = vector.load %arg8[%c0_16, %c0_17] : memref<16x128xf32, #tpu.memory_space<vmem>>, vector<16x128xf32>
      %25 = arith.addf %23, %24 : vector<16x128xf32>
      %c0_18 = arith.constant 0 : index
      %c0_19 = arith.constant 0 : index
      %26 = vector.load %arg6[%c0_18, %c0_19] : memref<16x128xf32, #tpu.memory_space<vmem>>, vector<16x128xf32>
      tpu.vector_store %arg6[%c0_18, %c0_19], %25 {strides = array<i32>} : memref<16x128xf32, #tpu.memory_space<vmem>>, vector<16x128xf32>,
    } else {
    }
    return
  }
  func.func @transform_0(%arg0: i32, %arg1: i32) -> (i32, i32) {
    %c0_i32 = arith.constant 0 : i32
    %c0_i32_0 = arith.constant 0 : i32
    return %arg0, %c0_i32 : i32, i32
  }
  func.func @transform_1(%arg0: i32, %arg1: i32) -> (i32, i32) {
    %c0_i32 = arith.constant 0 : i32
    %c0_i32_0 = arith.constant 0 : i32
    %c0_i32_1 = arith.constant 0 : i32
    return %c0_i32, %c0_i32_0 : i32, i32
  }
  func.func @transform_2(%arg0: i32, %arg1: i32) -> (i32, i32) {
    %c0_i32 = arith.constant 0 : i32
    %c0_i32_0 = arith.constant 0 : i32
    return %c0_i32, %arg1 : i32, i32
  }
  func.func @transform_3(%arg0: i32, %arg1: i32) -> (i32, i32) {
    %c0_i32 = arith.constant 0 : i32
    %c0_i32_0 = arith.constant 0 : i32
    return %arg1, %c0_i32 : i32, i32
  }
  func.func @transform_4(%arg0: i32, %arg1: i32) -> (i32, i32) {
    %c0_i32 = arith.constant 0 : i32
    %c0_i32_0 = arith.constant 0 : i32
    return %arg0, %c0_i32 : i32, i32
  }
}

</mosaic_0001>

<bundles_post_ra>
// kernel: tpu_custom_call.1
= control target key start
LH: loop header
LB: loop body
LE: loop exit
PB: predicated region body
PF: predicated region fallthrough
CT: control target
= control target key end

     0   :  { %9 = vsyncpa [#allocation5], 0  ;;  %s687_s0 = inlined_call_operand.hbm [shape: f32[16,128], index: 0, kind: input, shape index: {}]   ;;  %s688_s1 = inlined_call_operand.vmem [shape: f32[1,128], index: 1, kind: input, shape index: {}]   ;;  %s689_s2 = inlined_call_operand.hbm [shape: f32[128,256], index: 2, kind: input, shape index: {}]   ;;  %s690_s3 = inlined_call_operand.hbm [shape: f32[128,128], index: 3, kind: input, shape index: {}]   ;;  %s691_s4 = inlined_call_operand.hbm [shape: f32[16,128], index: 4, kind: output, shape index: {}]  }
   0x1   :  { %10 = vsyncpa [#allocation8], 0 }
   0x2   :  { %11 = vsyncpa [#allocation6], 0  ;;  %s581_s15 = smov [#allocation7]   ;;  %s487_s19 = scalar_lea.hbm %s689_s2, 4096 }
   0x3   :  { %s31_s16 = sshll.u32 %s581_s15, 4  ;;  %p488_p0 = scmp.ne.s32.totalorder %s689_s2, %s487_s19  ;;  %s32_s16 = int_to_ptr.vmem [resolvable:$true] %s31_s16 }
   0x4   :  { %p491_p1 = scmp.lt.u32.totalorder %s487_s19, %s689_s2 }
   0x6   :  { %p493_p2 = pnand %p491_p1, %p488_p0 }
   0x8   :  { %496 = shalt.err (!%p493_p2)
}
   0x9   :  { %s497_s24 = scalar_lea.vmem %s32_s16, 4096  ;;  %p502_p4 = scmp.lt.s32.totalorder %s32_s16, %s32_s16 }
   0xa   :  { %p498_p3 = scmp.ne.s32.totalorder %s32_s16, %s497_s24  ;;  %p503_p5 = scmp.lt.s32.totalorder %s497_s24, %s497_s24 }
   0xc   :  { %p504_p6 = por %p503_p5, %p502_p4 }
   0xe   :  { %p505_p7 = pnand %p504_p6, %p498_p3 }
  0x10   :  { %508 = shalt.err (!%p505_p7)
}
  0x11   :  { %s582_s25 = smov 256   ;;  %s583_s26 = smov 16  }
  0x12   :  { %37 = dma.hbm_to_vmem [thread:$0]  %s689_s2, 4096, %s32_s16, [#allocation8], %s582_s25, %s582_s25, %s583_s26  }
  0x13   :  { %s584_s29 = smov [#allocation4]   ;;  %s509_s7 = scalar_lea.hbm %s687_s0, 256 }
  0x14   :  { %s17_s30 = sshll.u32 %s584_s29, 4  ;;  %p510_p8 = scmp.ne.s32.totalorder %s687_s0, %s509_s7  ;;  %s18_s30 = int_to_ptr.vmem [resolvable:$true] %s17_s30 }
  0x15   :  { %p513_p9 = scmp.lt.u32.totalorder %s509_s7, %s687_s0 }
  0x17   :  { %p515_p10 = pnand %p513_p9, %p510_p8 }
  0x19   :  { %518 = shalt.err (!%p515_p10)
}
  0x1a   :  { %s519_s12 = scalar_lea.vmem %s18_s30, 256  ;;  %p524_p12 = scmp.lt.s32.totalorder %s18_s30, %s18_s30 }
  0x1b   :  { %p520_p11 = scmp.ne.s32.totalorder %s18_s30, %s519_s12  ;;  %p525_p13 = scmp.lt.s32.totalorder %s519_s12, %s519_s12 }
  0x1d   :  { %p526_p0 = por %p525_p13, %p524_p12 }
  0x1f   :  { %p527_p1 = pnand %p526_p0, %p520_p11 }
  0x21   :  { %530 = shalt.err (!%p527_p1)
}
  0x22   :  { %s585_s2 = smov 128   ;;  %s586_s13 = smov 8  }
  0x23   :  { %23 = dma.hbm_to_vmem [thread:$0]  %s687_s0, 256, %s18_s30, [#allocation5], %s585_s2, %s585_s2, %s586_s13  }
  0x24   :  { %s587_s16 = smov [#allocation9]   ;;  %s531_s20 = scalar_lea.hbm %s690_s3, 2048 }
  0x25   :  { %s43_s17 = sshll.u32 %s587_s16, 4  ;;  %p532_p2 = scmp.ne.s32.totalorder %s690_s3, %s531_s20  ;;  %s44_s17 = int_to_ptr.vmem [resolvable:$true] %s43_s17 }
  0x26   :  { %p535_p3 = scmp.lt.u32.totalorder %s531_s20, %s690_s3 }
  0x28   :  { %p537_p4 = pnand %p535_p3, %p532_p2 }
  0x2a   :  { %540 = shalt.err (!%p537_p4)
}
  0x2b   :  { %s541_s25 = scalar_lea.vmem %s44_s17, 2048  ;;  %p546_p6 = scmp.lt.s32.totalorder %s44_s17, %s44_s17 }
  0x2c   :  { %p542_p5 = scmp.ne.s32.totalorder %s44_s17, %s541_s25  ;;  %p547_p7 = scmp.lt.s32.totalorder %s541_s25, %s541_s25 }
  0x2e   :  { %p548_p8 = por %p547_p7, %p546_p6 }
  0x30   :  { %p549_p9 = pnand %p548_p8, %p542_p5 }
  0x32   :  { %552 = shalt.err (!%p549_p9)
}
  0x33   :  { %49 = dma.hbm_to_vmem [thread:$0]  %s690_s3, 2048, %s44_s17, [#allocation8], %s585_s2, %s585_s2, %s586_s13  }
  0x34   :  { %575 = dma.done.wait [#allocation5], 256  }
  0x35   :  { %576 = vsyncadd [#allocation5], 4294967040 }
  0x36   :  { %577 = dma.done.wait [#allocation8], 6144  }
  0x37   :  { %578 = vsyncadd [#allocation8], 4294961152  ;;  %v657_v0 = vld [vmem:[#allocation4] sm:$0xff]  ;;  %v659_v1 = vld [vmem:[#allocation4 + $0x8] sm:$0xff]  ;;  %v588_v47 = vmov 0.0  }
  0x38   :  { %v96_v2 = vld [vmem:[#allocation7 + $0x8] sm:$0xff]  ;;  %v65_v3 = vmul.f32 %v657_v0, %v657_v0  ;;  %v98_v4 = vld [vmem:[#allocation7 + $0x18] sm:$0xff]  ;;  %v95_v5 = vld [vmem:[#allocation7] sm:$0xff]  ;;  %v66_v12 = vmul.f32 %v659_v1, %v659_v1  ;;  %191 = vmatprep.mubr.f32.mxu0 %v588_v47 }
  0x39   :  { %v97_v6 = vld [vmem:[#allocation7 + $0x10] sm:$0xff]  ;;  %v402_v7 = vpack.c.bf16 %v98_v4, %v96_v2  ;;  %v100_v9 = vld [vmem:[#allocation7 + $0x28] sm:$0xff]  ;;  %v102_v10 = vld [vmem:[#allocation7 + $0x38] sm:$0xff] }
  0x3a   :  { %v404_v8 = vpack.c.bf16 %v97_v6, %v95_v5  ;;  %v99_v11 = vld [vmem:[#allocation7 + $0x20] sm:$0xff]  ;;  %67 = vadd.xlane.f32.xlu0 %v65_v3  ;;  %v406_v13 = vpack.c.bf16 %v102_v10, %v100_v9  ;;  %v101_v14 = vld [vmem:[#allocation7 + $0x30] sm:$0xff]  ;;  %v104_v15 = vld [vmem:[#allocation7 + $0x48] sm:$0xff] }
  0x3b   :  { %v106_v16 = vld [vmem:[#allocation7 + $0x58] sm:$0xff]  ;;  %403 = vmatprep.subr.bf16.mxu0 %v402_v7  ;;  %v408_v17 = vpack.c.bf16 %v101_v14, %v99_v11  ;;  %v103_v19 = vld [vmem:[#allocation7 + $0x40] sm:$0xff]  ;;  %v105_v20 = vld [vmem:[#allocation7 + $0x50] sm:$0xff] }
  0x3c   :  { %405 = vmatpush1.bf16.msra.mxu0 %v404_v8  ;;  %v410_v18 = vpack.c.bf16 %v106_v16, %v104_v15  ;;  %v108_v21 = vld [vmem:[#allocation7 + $0x68] sm:$0xff]  ;;  %v110_v22 = vld [vmem:[#allocation7 + $0x78] sm:$0xff]  ;;  %v412_v23 = vpack.c.bf16 %v105_v20, %v103_v19  ;;  %v107_v25 = vld [vmem:[#allocation7 + $0x60] sm:$0xff] }
  0x3d   :  { %407 = vmatprep.subr.bf16.mxu0 %v406_v13  ;;  %v414_v24 = vpack.c.bf16 %v110_v22, %v108_v21  ;;  %v109_v26 = vld [vmem:[#allocation7 + $0x70] sm:$0xff]  ;;  %v112_v28 = vld [vmem:[#allocation7 + $0x88] sm:$0xff]  ;;  %v114_v29 = vld [vmem:[#allocation7 + $0x98] sm:$0xff] }
  0x3e   :  { %69 = vadd.xlane.f32.xlu0 %v66_v12  ;;  %v416_v27 = vpack.c.bf16 %v109_v26, %v107_v25  ;;  %v418_v30 = vpack.c.bf16 %v114_v29, %v112_v28  ;;  %v111_v31 = vld [vmem:[#allocation7 + $0x80] sm:$0xff]  ;;  %v113_v32 = vld [vmem:[#allocation7 + $0x90] sm:$0xff]  ;;  %v116_v34 = vld [vmem:[#allocation7 + $0xa8] sm:$0xff] }
  0x3f   :  { %v420_v33 = vpack.c.bf16 %v113_v32, %v111_v31  ;;  %v118_v35 = vld [vmem:[#allocation7 + $0xb8] sm:$0xff]  ;;  %v115_v37 = vld [vmem:[#allocation7 + $0xa0] sm:$0xff]  ;;  %v117_v38 = vld [vmem:[#allocation7 + $0xb0] sm:$0xff] }
  0x40   :  { %409 = vmatpush1.bf16.msra.mxu0 %v408_v17  ;;  %v422_v36 = vpack.c.bf16 %v118_v35, %v116_v34  ;;  %v424_v39 = vpack.c.bf16 %v117_v38, %v115_v37  ;;  %v120_v40 = vld [vmem:[#allocation7 + $0xc8] sm:$0xff]  ;;  %v122_v41 = vld [vmem:[#allocation7 + $0xd8] sm:$0xff]  ;;  %v119_v42 = vld [vmem:[#allocation7 + $0xc0] sm:$0xff] }
  0x41   :  { %411 = vmatprep.subr.bf16.mxu0 %v410_v18  ;;  %v426_v43 = vpack.c.bf16 %v122_v41, %v120_v40  ;;  %v121_v44 = vld [vmem:[#allocation7 + $0xd0] sm:$0xff]  ;;  %v124_v45 = vld [vmem:[#allocation7 + $0xe8] sm:$0xff]  ;;  %v126_v46 = vld [vmem:[#allocation7 + $0xf8] sm:$0xff] }
  0x42   :  { %v428_v48 = vpack.c.bf16 %v121_v44, %v119_v42  ;;  %v430_v49 = vpack.c.bf16 %v126_v46, %v124_v45  ;;  %v123_v50 = vld [vmem:[#allocation7 + $0xe0] sm:$0xff]  ;;  %v125_v51 = vld [vmem:[#allocation7 + $0xf0] sm:$0xff]  ;;  %v223_v5 = vld [vmem:[#allocation9 + $0x8] sm:$0xff] }
  0x43   :  { %v432_v52 = vpack.c.bf16 %v125_v51, %v123_v50  ;;  %v346_v60 = vld [vmem:[%s688_s1] ss:$0 sm:$0xff]  ;;  %v222_v4 = vld [vmem:[#allocation9] sm:$0xff]  ;;  %v225_v8 = vld [vmem:[#allocation9 + $0x18] sm:$0xff]  ;;  %s589_s1 = smov [#allocation10]  }
  0x44   :  { %413 = vmatpush1.bf16.msra.mxu0 %v412_v23  ;;  %v434_v6 = vpack.c.bf16 %v223_v5, %v222_v4  ;;  %v224_v7 = vld [vmem:[#allocation9 + $0x10] sm:$0xff]  ;;  %v226_v10 = vld [vmem:[#allocation9 + $0x20] sm:$0xff]  ;;  %v227_v11 = vld [vmem:[#allocation9 + $0x28] sm:$0xff]  ;;  %s333_s28 = sshll.u32 %s589_s1, 4  ;;  %s334_s28 = int_to_ptr.vmem [resolvable:$true] %s333_s28 }
  0x45   :  { %415 = vmatprep.subr.bf16.mxu0 %v414_v24  ;;  %v438_v9 = vpack.c.bf16 %v225_v8, %v224_v7  ;;  %v442_v12 = vpack.c.bf16 %v227_v11, %v226_v10  ;;  %v228_v13 = vld [vmem:[#allocation9 + $0x30] sm:$0xff]  ;;  %v229_v14 = vld [vmem:[#allocation9 + $0x38] sm:$0xff]  ;;  %v230_v16 = vld [vmem:[#allocation9 + $0x40] sm:$0xff]  ;;  %s553_s29 = scalar_lea.vmem %s334_s28, 256  ;;  %p558_p11 = scmp.lt.s32.totalorder %s334_s28, %s334_s28 }
  0x46   :  { %435 = vmatprep.subr.bf16.mxu1 %v434_v6  ;;  %v446_v15 = vpack.c.bf16 %v229_v14, %v228_v13  ;;  %v231_v17 = vld [vmem:[#allocation9 + $0x48] sm:$0xff]  ;;  %v232_v19 = vld [vmem:[#allocation9 + $0x50] sm:$0xff]  ;;  %v233_v20 = vld [vmem:[#allocation9 + $0x58] sm:$0xff]  ;;  %p554_p10 = scmp.ne.s32.totalorder %s334_s28, %s553_s29  ;;  %p559_p12 = scmp.lt.s32.totalorder %s553_s29, %s553_s29 }
  0x47   :  { %437 = vmatpush3.bf16.msra.mxu1 %v434_v6  ;;  %v450_v18 = vpack.c.bf16 %v231_v17, %v230_v16  ;;  %v454_v21 = vpack.c.bf16 %v233_v20, %v232_v19  ;;  %v234_v22 = vld [vmem:[#allocation9 + $0x60] sm:$0xff]  ;;  %v235_v23 = vld [vmem:[#allocation9 + $0x68] sm:$0xff]  ;;  %v236_v25 = vld [vmem:[#allocation9 + $0x70] sm:$0xff] }
  0x48   :  { %417 = vmatpush1.bf16.msra.mxu0 %v416_v27  ;;  %439 = vmatprep.subr.bf16.mxu1 %v438_v9  ;;  %v458_v24 = vpack.c.bf16 %v235_v23, %v234_v22  ;;  %v237_v26 = vld [vmem:[#allocation9 + $0x78] sm:$0xff]  ;;  %p560_p13 = por %p559_p12, %p558_p11 }
  0x49   :  { %419 = vmatprep.subr.bf16.mxu0 %v418_v30  ;;  %v462_v27 = vpack.c.bf16 %v237_v26, %v236_v25 }
  0x4a   :  { %p561_p0 = pnand %p560_p13, %p554_p10 }
  0x4b   :  { %441 = vmatpush3.bf16.msra.mxu1 %v438_v9 }
  0x4c   :  { %421 = vmatpush1.bf16.msra.mxu0 %v420_v33  ;;  %443 = vmatprep.subr.bf16.mxu1 %v442_v12 }
  0x4d   :  { %423 = vmatprep.subr.bf16.mxu0 %v422_v36 }
  0x4f   :  { %445 = vmatpush3.bf16.msra.mxu1 %v442_v12 }
  0x50   :  { %425 = vmatpush1.bf16.msra.mxu0 %v424_v39  ;;  %447 = vmatprep.subr.bf16.mxu1 %v446_v15 }
  0x51   :  { %427 = vmatprep.subr.bf16.mxu0 %v426_v43 }
  0x53   :  { %449 = vmatpush3.bf16.msra.mxu1 %v446_v15 }
  0x54   :  { %429 = vmatpush1.bf16.msra.mxu0 %v428_v48  ;;  %451 = vmatprep.subr.bf16.mxu1 %v450_v18 }
  0x55   :  { %431 = vmatprep.subr.bf16.mxu0 %v430_v49 }
  0x57   :  { %453 = vmatpush3.bf16.msra.mxu1 %v450_v18 }
  0x58   :  { %433 = vmatpush1.bf16.msra.mxu0 %v432_v52  ;;  %455 = vmatprep.subr.bf16.mxu1 %v454_v21 }
  0x5b   :  { %457 = vmatpush3.bf16.msra.mxu1 %v454_v21 }
  0x5c   :  { %459 = vmatprep.subr.bf16.mxu1 %v458_v24 }
  0x5f   :  { %461 = vmatpush3.bf16.msra.mxu1 %v458_v24 }
  0x60   :  { %463 = vmatprep.subr.bf16.mxu1 %v462_v27 }
  0x63   :  { %465 = vmatpush3.bf16.msra.mxu1 %v462_v27 }
  0xc7   :  { %v68_v53 = vpop.xlane.xlu0 %67 }
  0xc8   :  { %v72_v54 = vmul.f32 0.0078125, %v68_v53 }
  0xca   :  { %v74_v55 = vadd.f32 1e-05, %v72_v54 }
  0xcb   :  { %v70_v56 = vpop.xlane.xlu0 %69 }
  0xcc   :  { %475 = vrsqrt.f32 %v74_v55  ;;  %v73_v57 = vmul.f32 0.0078125, %v70_v56 }
  0xce   :  { %v75_v58 = vadd.f32 1e-05, %v73_v57 }
  0xd0   :  { %477 = vrsqrt.f32 %v75_v58 }
  0xd6   :  { %v476_v59 = vpop.eup %475 }
  0xd7   :  { %v78_v61 = vmul.f32 %v476_v59, %v657_v0 }
  0xd9   :  { %v87_v62 = vmul.f32 %v346_v60, %v78_v61 }
  0xda   :  { %v478_v63 = vpop.eup %477 }
  0xdb   :  { %192 = vmatmul.mubr.f32.vlgmr.msra.gmra.mrb[0].mxu0 %v87_v62  ;;  %v79_v2 = vmul.f32 %v478_v63, %v659_v1 }
  0xdc   :  { %197 = vmatprep.mubr.f32.mxu0 %v588_v47 }
  0xdd   :  { %v88_v3 = vmul.f32 %v346_v60, %v79_v2 }
  0xdf   :  { %198 = vmatmul.mubr.f32.gmra.mrb[2].mxu0 %v88_v3 }
 0x1ae   :  { %v193_v28 = vpop.f32.mrb[0].mxu0 }
 0x1af   :  { %v347_v29 = vmul.f32 -1.442695, %v193_v28  ;;  %v195_v30 = vpop.f32.mrb[1].mxu0 }
 0x1b1   :  { %479 = vpow2.f32 %v347_v29 }
 0x1b2   :  { %v199_v31 = vpop.f32.mrb[2].mxu0 }
 0x1b3   :  { %v348_v32 = vmul.f32 -1.442695, %v199_v31  ;;  %v201_v33 = vpop.f32.mrb[3].mxu0 }
 0x1b5   :  { %481 = vpow2.f32 %v348_v32 }
 0x1bb   :  { %v480_v34 = vpop.eup %479 }
 0x1bc   :  { %v210_v35 = vadd.f32 1.0, %v480_v34 }
 0x1be   :  { %483 = vrcp.f32 %v210_v35 }
 0x1bf   :  { %v482_v36 = vpop.eup %481 }
 0x1c0   :  { %v211_v37 = vadd.f32 1.0, %v482_v36 }
 0x1c2   :  { %485 = vrcp.f32 %v211_v37 }
 0x1c8   :  { %v484_v38 = vpop.eup %483 }
 0x1c9   :  { %v216_v39 = vmul.f32 %v484_v38, %v193_v28 }
 0x1cb   :  { %v218_v40 = vmul.f32 %v216_v39, %v195_v30 }
 0x1cc   :  { %v486_v41 = vpop.eup %485 }
 0x1cd   :  { %v217_v42 = vmul.f32 %v486_v41, %v199_v31  ;;  %399 = vmatprep.mubr.f32.mxu1 %v218_v40 }
 0x1cf   :  { %v219_v43 = vmul.f32 %v217_v42, %v201_v33 }
 0x1d1   :  { %400 = vmatmul.mubr.f32.vlgmr.msra.gmra.mrb[0].mxu1 %v219_v43 }
 0x2a4   :  { %v401_v44 = vpop.f32.mrb[0].mxu1 }
 0x2a5   :  { %v325_v45 = vadd.f32 %v401_v44, %v659_v1  ;;  %v304_v46 = vpop.f32.mrb[1].mxu1 }
 0x2a6   :  { %v324_v47 = vadd.f32 %v304_v46, %v657_v0 }
 0x2a7   :  { %327 = vst [vmem:[#allocation10 + $0x8] sm:$0xff] %v325_v45 }
 0x2a8   :  { %326 = vst [vmem:[#allocation10] sm:$0xff] %v324_v47 }
 0x2a9   :  { %564 = shalt.err (!%p561_p0)
}
 0x2aa   :  { %s565_s6 = scalar_lea.hbm %s691_s4, 256 }
 0x2ab   :  { %p566_p1 = scmp.ne.s32.totalorder %s691_s4, %s565_s6  ;;  %p569_p2 = scmp.lt.u32.totalorder %s565_s6, %s691_s4 }
 0x2ad   :  { %p571_p3 = pnand %p569_p2, %p566_p1 }
 0x2af   :  { %574 = shalt.err (!%p571_p3)
}
 0x2b0   :  { %339 = dma.vmem_to_hbm [thread:$0]  %s334_s28, 256, %s691_s4, [#allocation6], %s585_s2, %s585_s2, %s586_s13  }
 0x2b1   :  { %579 = dma.done.wait [#allocation6], 256  }
 0x2b2   :  { %580 = vsyncadd [#allocation6], 4294967040 }
 0x2b3   :  { %343 = vsyncpa [#allocation5], 1 }
 0x2b4   :  { %344 = vsyncpa [#allocation8], 1 }
 0x2b5   :  { %345 = vsyncpa [#allocation6], 1 }

// kernel: tpu_custom_call.1
= control target key start
LH: loop header
LB: loop body
LE: loop exit
PB: predicated region body
PF: predicated region fallthrough
CT: control target
= control target key end

     0   :  { %9 = vsyncpa [#allocation5], 0  ;;  %s687_s0 = inlined_call_operand.hbm [shape: f32[16,128], index: 0, kind: input, shape index: {}]   ;;  %s688_s1 = inlined_call_operand.vmem [shape: f32[1,128], index: 1, kind: input, shape index: {}]   ;;  %s689_s2 = inlined_call_operand.hbm [shape: f32[128,256], index: 2, kind: input, shape index: {}]   ;;  %s690_s3 = inlined_call_operand.hbm [shape: f32[128,128], index: 3, kind: input, shape index: {}]   ;;  %s691_s4 = inlined_call_operand.hbm [shape: f32[16,128], index: 4, kind: output, shape index: {}]  }
   0x1   :  { %10 = vsyncpa [#allocation8], 0 }
   0x2   :  { %11 = vsyncpa [#allocation6], 0  ;;  %s581_s15 = smov [#allocation7]   ;;  %s487_s19 = scalar_lea.hbm %s689_s2, 4096 }
   0x3   :  { %s31_s16 = sshll.u32 %s581_s15, 4  ;;  %p488_p0 = scmp.ne.s32.totalorder %s689_s2, %s487_s19  ;;  %s32_s16 = int_to_ptr.vmem [resolvable:$true] %s31_s16 }
   0x4   :  { %p491_p1 = scmp.lt.u32.totalorder %s487_s19, %s689_s2 }
   0x6   :  { %p493_p2 = pnand %p491_p1, %p488_p0 }
   0x8   :  { %496 = shalt.err (!%p493_p2)
}
   0x9   :  { %s497_s24 = scalar_lea.vmem %s32_s16, 4096  ;;  %p502_p4 = scmp.lt.s32.totalorder %s32_s16, %s32_s16 }
   0xa   :  { %p498_p3 = scmp.ne.s32.totalorder %s32_s16, %s497_s24  ;;  %p503_p5 = scmp.lt.s32.totalorder %s497_s24, %s497_s24 }
   0xc   :  { %p504_p6 = por %p503_p5, %p502_p4 }
   0xe   :  { %p505_p7 = pnand %p504_p6, %p498_p3 }
  0x10   :  { %508 = shalt.err (!%p505_p7)
}
  0x11   :  { %s582_s25 = smov 256   ;;  %s583_s26 = smov 16  }
  0x12   :  { %37 = dma.hbm_to_vmem [thread:$0]  %s689_s2, 4096, %s32_s16, [#allocation8], %s582_s25, %s582_s25, %s583_s26  }
  0x13   :  { %s584_s29 = smov [#allocation4]   ;;  %s509_s7 = scalar_lea.hbm %s687_s0, 256 }
  0x14   :  { %s17_s30 = sshll.u32 %s584_s29, 4  ;;  %p510_p8 = scmp.ne.s32.totalorder %s687_s0, %s509_s7  ;;  %s18_s30 = int_to_ptr.vmem [resolvable:$true] %s17_s30 }
  0x15   :  { %p513_p9 = scmp.lt.u32.totalorder %s509_s7, %s687_s0 }
  0x17   :  { %p515_p10 = pnand %p513_p9, %p510_p8 }
  0x19   :  { %518 = shalt.err (!%p515_p10)
}
  0x1a   :  { %s519_s12 = scalar_lea.vmem %s18_s30, 256  ;;  %p524_p12 = scmp.lt.s32.totalorder %s18_s30, %s18_s30 }
  0x1b   :  { %p520_p11 = scmp.ne.s32.totalorder %s18_s30, %s519_s12  ;;  %p525_p13 = scmp.lt.s32.totalorder %s519_s12, %s519_s12 }
  0x1d   :  { %p526_p0 = por %p525_p13, %p524_p12 }
  0x1f   :  { %p527_p1 = pnand %p526_p0, %p520_p11 }
  0x21   :  { %530 = shalt.err (!%p527_p1)
}
  0x22   :  { %s585_s2 = smov 128   ;;  %s586_s13 = smov 8  }
  0x23   :  { %23 = dma.hbm_to_vmem [thread:$0]  %s687_s0, 256, %s18_s30, [#allocation5], %s585_s2, %s585_s2, %s586_s13  }
  0x24   :  { %s587_s16 = smov [#allocation9]   ;;  %s531_s20 = scalar_lea.hbm %s690_s3, 2048 }
  0x25   :  { %s43_s17 = sshll.u32 %s587_s16, 4  ;;  %p532_p2 = scmp.ne.s32.totalorder %s690_s3, %s531_s20  ;;  %s44_s17 = int_to_ptr.vmem [resolvable:$true] %s43_s17 }
  0x26   :  { %p535_p3 = scmp.lt.u32.totalorder %s531_s20, %s690_s3 }
  0x28   :  { %p537_p4 = pnand %p535_p3, %p532_p2 }
  0x2a   :  { %540 = shalt.err (!%p537_p4)
}
  0x2b   :  { %s541_s25 = scalar_lea.vmem %s44_s17, 2048  ;;  %p546_p6 = scmp.lt.s32.totalorder %s44_s17, %s44_s17 }
  0x2c   :  { %p542_p5 = scmp.ne.s32.totalorder %s44_s17, %s541_s25  ;;  %p547_p7 = scmp.lt.s32.totalorder %s541_s25, %s541_s25 }
  0x2e   :  { %p548_p8 = por %p547_p7, %p546_p6 }
  0x30   :  { %p549_p9 = pnand %p548_p8, %p542_p5 }
  0x32   :  { %552 = shalt.err (!%p549_p9)
}
  0x33   :  { %49 = dma.hbm_to_vmem [thread:$0]  %s690_s3, 2048, %s44_s17, [#allocation8], %s585_s2, %s585_s2, %s586_s13  }
  0x34   :  { %575 = dma.done.wait [#allocation5], 256  }
  0x35   :  { %576 = vsyncadd [#allocation5], 4294967040 }
  0x36   :  { %577 = dma.done.wait [#allocation8], 6144  }
  0x37   :  { %578 = vsyncadd [#allocation8], 4294961152  ;;  %v657_v0 = vld [vmem:[#allocation4] sm:$0xff]  ;;  %v659_v1 = vld [vmem:[#allocation4 + $0x8] sm:$0xff]  ;;  %v588_v47 = vmov 0.0  }
  0x38   :  { %v96_v2 = vld [vmem:[#allocation7 + $0x8] sm:$0xff]  ;;  %v65_v3 = vmul.f32 %v657_v0, %v657_v0  ;;  %v98_v4 = vld [vmem:[#allocation7 + $0x18] sm:$0xff]  ;;  %v95_v5 = vld [vmem:[#allocation7] sm:$0xff]  ;;  %v66_v12 = vmul.f32 %v659_v1, %v659_v1  ;;  %191 = vmatprep.mubr.f32.mxu0 %v588_v47 }
  0x39   :  { %v97_v6 = vld [vmem:[#allocation7 + $0x10] sm:$0xff]  ;;  %v402_v7 = vpack.c.bf16 %v98_v4, %v96_v2  ;;  %v100_v9 = vld [vmem:[#allocation7 + $0x28] sm:$0xff]  ;;  %v102_v10 = vld [vmem:[#allocation7 + $0x38] sm:$0xff] }
  0x3a   :  { %v404_v8 = vpack.c.bf16 %v97_v6, %v95_v5  ;;  %v99_v11 = vld [vmem:[#allocation7 + $0x20] sm:$0xff]  ;;  %67 = vadd.xlane.f32.xlu0 %v65_v3  ;;  %v406_v13 = vpack.c.bf16 %v102_v10, %v100_v9  ;;  %v101_v14 = vld [vmem:[#allocation7 + $0x30] sm:$0xff]  ;;  %v104_v15 = vld [vmem:[#allocation7 + $0x48] sm:$0xff] }
  0x3b   :  { %v106_v16 = vld [vmem:[#allocation7 + $0x58] sm:$0xff]  ;;  %403 = vmatprep.subr.bf16.mxu0 %v402_v7  ;;  %v408_v17 = vpack.c.bf16 %v101_v14, %v99_v11  ;;  %v103_v19 = vld [vmem:[#allocation7 + $0x40] sm:$0xff]  ;;  %v105_v20 = vld [vmem:[#allocation7 + $0x50] sm:$0xff] }
  0x3c   :  { %405 = vmatpush1.bf16.msra.mxu0 %v404_v8  ;;  %v410_v18 = vpack.c.bf16 %v106_v16, %v104_v15  ;;  %v108_v21 = vld [vmem:[#allocation7 + $0x68] sm:$0xff]  ;;  %v110_v22 = vld [vmem:[#allocation7 + $0x78] sm:$0xff]  ;;  %v412_v23 = vpack.c.bf16 %v105_v20, %v103_v19  ;;  %v107_v25 = vld [vmem:[#allocation7 + $0x60] sm:$0xff] }
  0x3d   :  { %407 = vmatprep.subr.bf16.mxu0 %v406_v13  ;;  %v414_v24 = vpack.c.bf16 %v110_v22, %v108_v21  ;;  %v109_v26 = vld [vmem:[#allocation7 + $0x70] sm:$0xff]  ;;  %v112_v28 = vld [vmem:[#allocation7 + $0x88] sm:$0xff]  ;;  %v114_v29 = vld [vmem:[#allocation7 + $0x98] sm:$0xff] }
  0x3e   :  { %69 = vadd.xlane.f32.xlu0 %v66_v12  ;;  %v416_v27 = vpack.c.bf16 %v109_v26, %v107_v25  ;;  %v418_v30 = vpack.c.bf16 %v114_v29, %v112_v28  ;;  %v111_v31 = vld [vmem:[#allocation7 + $0x80] sm:$0xff]  ;;  %v113_v32 = vld [vmem:[#allocation7 + $0x90] sm:$0xff]  ;;  %v116_v34 = vld [vmem:[#allocation7 + $0xa8] sm:$0xff] }
  0x3f   :  { %v420_v33 = vpack.c.bf16 %v113_v32, %v111_v31  ;;  %v118_v35 = vld [vmem:[#allocation7 + $0xb8] sm:$0xff]  ;;  %v115_v37 = vld [vmem:[#allocation7 + $0xa0] sm:$0xff]  ;;  %v117_v38 = vld [vmem:[#allocation7 + $0xb0] sm:$0xff] }
  0x40   :  { %409 = vmatpush1.bf16.msra.mxu0 %v408_v17  ;;  %v422_v36 = vpack.c.bf16 %v118_v35, %v116_v34  ;;  %v424_v39 = vpack.c.bf16 %v117_v38, %v115_v37  ;;  %v120_v40 = vld [vmem:[#allocation7 + $0xc8] sm:$0xff]  ;;  %v122_v41 = vld [vmem:[#allocation7 + $0xd8] sm:$0xff]  ;;  %v119_v42 = vld [vmem:[#allocation7 + $0xc0] sm:$0xff] }
  0x41   :  { %411 = vmatprep.subr.bf16.mxu0 %v410_v18  ;;  %v426_v43 = vpack.c.bf16 %v122_v41, %v120_v40  ;;  %v121_v44 = vld [vmem:[#allocation7 + $0xd0] sm:$0xff]  ;;  %v124_v45 = vld [vmem:[#allocation7 + $0xe8] sm:$0xff]  ;;  %v126_v46 = vld [vmem:[#allocation7 + $0xf8] sm:$0xff] }
  0x42   :  { %v428_v48 = vpack.c.bf16 %v121_v44, %v119_v42  ;;  %v430_v49 = vpack.c.bf16 %v126_v46, %v124_v45  ;;  %v123_v50 = vld [vmem:[#allocation7 + $0xe0] sm:$0xff]  ;;  %v125_v51 = vld [vmem:[#allocation7 + $0xf0] sm:$0xff]  ;;  %v223_v5 = vld [vmem:[#allocation9 + $0x8] sm:$0xff] }
  0x43   :  { %v432_v52 = vpack.c.bf16 %v125_v51, %v123_v50  ;;  %v346_v60 = vld [vmem:[%s688_s1] ss:$0 sm:$0xff]  ;;  %v222_v4 = vld [vmem:[#allocation9] sm:$0xff]  ;;  %v225_v8 = vld [vmem:[#allocation9 + $0x18] sm:$0xff]  ;;  %s589_s1 = smov [#allocation10]  }
  0x44   :  { %413 = vmatpush1.bf16.msra.mxu0 %v412_v23  ;;  %v434_v6 = vpack.c.bf16 %v223_v5, %v222_v4  ;;  %v224_v7 = vld [vmem:[#allocation9 + $0x10] sm:$0xff]  ;;  %v226_v10 = vld [vmem:[#allocation9 + $0x20] sm:$0xff]  ;;  %v227_v11 = vld [vmem:[#allocation9 + $0x28] sm:$0xff]  ;;  %s333_s28 = sshll.u32 %s589_s1, 4  ;;  %s334_s28 = int_to_ptr.vmem [resolvable:$true] %s333_s28 }
  0x45   :  { %415 = vmatprep.subr.bf16.mxu0 %v414_v24  ;;  %v438_v9 = vpack.c.bf16 %v225_v8, %v224_v7  ;;  %v442_v12 = vpack.c.bf16 %v227_v11, %v226_v10  ;;  %v228_v13 = vld [vmem:[#allocation9 + $0x30] sm:$0xff]  ;;  %v229_v14 = vld [vmem:[#allocation9 + $0x38] sm:$0xff]  ;;  %v230_v16 = vld [vmem:[#allocation9 + $0x40] sm:$0xff]  ;;  %s553_s29 = scalar_lea.vmem %s334_s28, 256  ;;  %p558_p11 = scmp.lt.s32.totalorder %s334_s28, %s334_s28 }
  0x46   :  { %435 = vmatprep.subr.bf16.mxu1 %v434_v6  ;;  %v446_v15 = vpack.c.bf16 %v229_v14, %v228_v13  ;;  %v231_v17 = vld [vmem:[#allocation9 + $0x48] sm:$0xff]  ;;  %v232_v19 = vld [vmem:[#allocation9 + $0x50] sm:$0xff]  ;;  %v233_v20 = vld [vmem:[#allocation9 + $0x58] sm:$0xff]  ;;  %p554_p10 = scmp.ne.s32.totalorder %s334_s28, %s553_s29  ;;  %p559_p12 = scmp.lt.s32.totalorder %s553_s29, %s553_s29 }
  0x47   :  { %437 = vmatpush3.bf16.msra.mxu1 %v434_v6  ;;  %v450_v18 = vpack.c.bf16 %v231_v17, %v230_v16  ;;  %v454_v21 = vpack.c.bf16 %v233_v20, %v232_v19  ;;  %v234_v22 = vld [vmem:[#allocation9 + $0x60] sm:$0xff]  ;;  %v235_v23 = vld [vmem:[#allocation9 + $0x68] sm:$0xff]  ;;  %v236_v25 = vld [vmem:[#allocation9 + $0x70] sm:$0xff] }
  0x48   :  { %417 = vmatpush1.bf16.msra.mxu0 %v416_v27  ;;  %439 = vmatprep.subr.bf16.mxu1 %v438_v9  ;;  %v458_v24 = vpack.c.bf16 %v235_v23, %v234_v22  ;;  %v237_v26 = vld [vmem:[#allocation9 + $0x78] sm:$0xff]  ;;  %p560_p13 = por %p559_p12, %p558_p11 }
  0x49   :  { %419 = vmatprep.subr.bf16.mxu0 %v418_v30  ;;  %v462_v27 = vpack.c.bf16 %v237_v26, %v236_v25 }
  0x4a   :  { %p561_p0 = pnand %p560_p13, %p554_p10 }
  0x4b   :  { %441 = vmatpush3.bf16.msra.mxu1 %v438_v9 }
  0x4c   :  { %421 = vmatpush1.bf16.msra.mxu0 %v420_v33  ;;  %443 = vmatprep.subr.bf16.mxu1 %v442_v12 }
  0x4d   :  { %423 = vmatprep.subr.bf16.mxu0 %v422_v36 }
  0x4f   :  { %445 = vmatpush3.bf16.msra.mxu1 %v442_v12 }
  0x50   :  { %425 = vmatpush1.bf16.msra.mxu0 %v424_v39  ;;  %447 = vmatprep.subr.bf16.mxu1 %v446_v15 }
  0x51   :  { %427 = vmatprep.subr.bf16.mxu0 %v426_v43 }
  0x53   :  { %449 = vmatpush3.bf16.msra.mxu1 %v446_v15 }
  0x54   :  { %429 = vmatpush1.bf16.msra.mxu0 %v428_v48  ;;  %451 = vmatprep.subr.bf16.mxu1 %v450_v18 }
  0x55   :  { %431 = vmatprep.subr.bf16.mxu0 %v430_v49 }
  0x57   :  { %453 = vmatpush3.bf16.msra.mxu1 %v450_v18 }
  0x58   :  { %433 = vmatpush1.bf16.msra.mxu0 %v432_v52  ;;  %455 = vmatprep.subr.bf16.mxu1 %v454_v21 }
  0x5b   :  { %457 = vmatpush3.bf16.msra.mxu1 %v454_v21 }
  0x5c   :  { %459 = vmatprep.subr.bf16.mxu1 %v458_v24 }
  0x5f   :  { %461 = vmatpush3.bf16.msra.mxu1 %v458_v24 }
  0x60   :  { %463 = vmatprep.subr.bf16.mxu1 %v462_v27 }
  0x63   :  { %465 = vmatpush3.bf16.msra.mxu1 %v462_v27 }
  0xc7   :  { %v68_v53 = vpop.xlane.xlu0 %67 }
  0xc8   :  { %v72_v54 = vmul.f32 0.0078125, %v68_v53 }
  0xca   :  { %v74_v55 = vadd.f32 1e-05, %v72_v54 }
  0xcb   :  { %v70_v56 = vpop.xlane.xlu0 %69 }
  0xcc   :  { %475 = vrsqrt.f32 %v74_v55  ;;  %v73_v57 = vmul.f32 0.0078125, %v70_v56 }
  0xce   :  { %v75_v58 = vadd.f32 1e-05, %v73_v57 }
  0xd0   :  { %477 = vrsqrt.f32 %v75_v58 }
  0xd6   :  { %v476_v59 = vpop.eup %475 }
  0xd7   :  { %v78_v61 = vmul.f32 %v476_v59, %v657_v0 }
  0xd9   :  { %v87_v62 = vmul.f32 %v346_v60, %v78_v61 }
  0xda   :  { %v478_v63 = vpop.eup %477 }
  0xdb   :  { %192 = vmatmul.mubr.f32.vlgmr.msra.gmra.mrb[0].mxu0 %v87_v62  ;;  %v79_v2 = vmul.f32 %v478_v63, %v659_v1 }
  0xdc   :  { %197 = vmatprep.mubr.f32.mxu0 %v588_v47 }
  0xdd   :  { %v88_v3 = vmul.f32 %v346_v60, %v79_v2 }
  0xdf   :  { %198 = vmatmul.mubr.f32.gmra.mrb[2].mxu0 %v88_v3 }
 0x1ae   :  { %v193_v28 = vpop.f32.mrb[0].mxu0 }
 0x1af   :  { %v347_v29 = vmul.f32 -1.442695, %v193_v28  ;;  %v195_v30 = vpop.f32.mrb[1].mxu0 }
 0x1b1   :  { %479 = vpow2.f32 %v347_v29 }
 0x1b2   :  { %v199_v31 = vpop.f32.mrb[2].mxu0 }
 0x1b3   :  { %v348_v32 = vmul.f32 -1.442695, %v199_v31  ;;  %v201_v33 = vpop.f32.mrb[3].mxu0 }
 0x1b5   :  { %481 = vpow2.f32 %v348_v32 }
 0x1bb   :  { %v480_v34 = vpop.eup %479 }
 0x1bc   :  { %v210_v35 = vadd.f32 1.0, %v480_v34 }
 0x1be   :  { %483 = vrcp.f32 %v210_v35 }
 0x1bf   :  { %v482_v36 = vpop.eup %481 }
 0x1c0   :  { %v211_v37 = vadd.f32 1.0, %v482_v36 }
 0x1c2   :  { %485 = vrcp.f32 %v211_v37 }
 0x1c8   :  { %v484_v38 = vpop.eup %483 }
 0x1c9   :  { %v216_v39 = vmul.f32 %v484_v38, %v193_v28 }
 0x1cb   :  { %v218_v40 = vmul.f32 %v216_v39, %v195_v30 }
 0x1cc   :  { %v486_v41 = vpop.eup %485 }
 0x1cd   :  { %v217_v42 = vmul.f32 %v486_v41, %v199_v31  ;;  %399 = vmatprep.mubr.f32.mxu1 %v218_v40 }
 0x1cf   :  { %v219_v43 = vmul.f32 %v217_v42, %v201_v33 }
 0x1d1   :  { %400 = vmatmul.mubr.f32.vlgmr.msra.gmra.mrb[0].mxu1 %v219_v43 }
 0x2a4   :  { %v401_v44 = vpop.f32.mrb[0].mxu1 }
 0x2a5   :  { %v325_v45 = vadd.f32 %v401_v44, %v659_v1  ;;  %v304_v46 = vpop.f32.mrb[1].mxu1 }
 0x2a6   :  { %v324_v47 = vadd.f32 %v304_v46, %v657_v0 }
 0x2a7   :  { %327 = vst [vmem:[#allocation10 + $0x8] sm:$0xff] %v325_v45 }
 0x2a8   :  { %326 = vst [vmem:[#allocation10] sm:$0xff] %v324_v47 }
 0x2a9   :  { %564 = shalt.err (!%p561_p0)
}
 0x2aa   :  { %s565_s6 = scalar_lea.hbm %s691_s4, 256 }
 0x2ab   :  { %p566_p1 = scmp.ne.s32.totalorder %s691_s4, %s565_s6  ;;  %p569_p2 = scmp.lt.u32.totalorder %s565_s6, %s691_s4 }
 0x2ad   :  { %p571_p3 = pnand %p569_p2, %p566_p1 }
 0x2af   :  { %574 = shalt.err (!%p571_p3)
}
 0x2b0   :  { %339 = dma.vmem_to_hbm [thread:$0]  %s334_s28, 256, %s691_s4, [#allocation6], %s585_s2, %s585_s2, %s586_s13  }
 0x2b1   :  { %579 = dma.done.wait [#allocation6], 256  }
 0x2b2   :  { %580 = vsyncadd [#allocation6], 4294967040 }
 0x2b3   :  { %343 = vsyncpa [#allocation5], 1 }
 0x2b4   :  { %344 = vsyncpa [#allocation8], 1 }
 0x2b5   :  { %345 = vsyncpa [#allocation6], 1 }

</bundles_post_ra>
